<compile_context>
chip_gen: v6e
topology: v6e:2x2x1
jax: 0.10.0
libtpu: 0.0.40
codegen_flags: <defaults>
</compile_context>

<pallas_src>
import functools

import jax
import jax.numpy as jnp
import numpy as np
from jax.experimental import pallas as pl
from jax.experimental.pallas import tpu as pltpu


def _upsample_unit_kernel(x_ref, w_ref, masks_ref, scale_ref, shift_ref, o_ref,
                          im2col_ref, *, H, W, Cin, Cout):
    """One batch element per grid step.

    x_ref:      (1, Cin, H*W)   flattened NCHW input (compute dtype)
    w_ref:      (Cout, 9*Cin)   packed +/-1 weights; tap t = (dh+1)*3+(dw+1)
                                lives in cols [t*Cin, (t+1)*Cin)
    masks_ref:  (9, H*W)        {0,1} validity mask per tap (row+col in range)
    scale_ref:  (Cout, 1)       BN scale  gamma/sqrt(var+eps)          (f32)
    shift_ref:  (Cout, 1)       folded bias+BN shift (bias-mean)*s+beta (f32)
    o_ref:      (1, Cout, H*W)
    im2col_ref: (9*Cin, H*W)    VMEM scratch holding the stacked taps
    """
    HW = H * W
    xf = x_ref[0]                                   # (Cin, HW), lane-dense

    # Build the (9*Cin, HW) im2col operand: tap t holds x shifted by (dh, dw),
    # with positions whose source pixel falls outside the image zeroed.
    t = 0
    for dh in (-1, 0, 1):
        for dw in (-1, 0, 1):
            d = dh * W + dw                         # static flat displacement
            if d == 0:
                xs = xf                             # center tap: no shift/mask
            else:
                # result[:, p] = xf[:, (p + d) mod HW]  (XLU rotate, jnp.roll
                # convention), then zero every wrapped / out-of-image column.
                xs = pltpu.roll(xf, (-d) % HW, axis=1)
                xs = xs * masks_ref[t:t + 1, :]     # (1,HW) bcast over Cin
            im2col_ref[t * Cin:(t + 1) * Cin, :] = xs
            t += 1

    # Single MXU matmul: (Cout, 9*Cin) x (9*Cin, HW) -> (Cout, HW), f32 acc.
    acc = jnp.dot(w_ref[...], im2col_ref[...],
                  preferred_element_type=jnp.float32)

    # Epilogue: BN scale/shift + ReLU (weights stay exactly +/-1).
    y = acc * scale_ref[...] + shift_ref[...]
    o_ref[0] = jnp.maximum(y, 0.0).astype(o_ref.dtype)


def prepare_params(params, H, W, *, eps=1e-5, compute_dtype=jnp.float32):
    """One-time host-side prep: packed +/-1 weights, tap masks, BN scale/shift.

    Call once at parameter-load time; the results are plain arrays passed to
    the (jitted) forward so none of this is rebuilt per call.
    """
    w_tr = jnp.asarray(params["conv_w"], jnp.float32)    # (Cin, Cout, 3, 3)
    bias = jnp.asarray(params["conv_b"], jnp.float32)    # (Cout,)
    gamma = jnp.asarray(params["bn_gamma"], jnp.float32)
    beta = jnp.asarray(params["bn_beta"], jnp.float32)
    mean = jnp.asarray(params["bn_mean"], jnp.float32)
    var = jnp.asarray(params["bn_var"], jnp.float32)

    Cin, Cout = int(w_tr.shape[0]), int(w_tr.shape[1])
    HW = H * W

    # Binarize: sign(w), sign(0)=+1 (see TODO at top).
    w_bin = jnp.where(w_tr >= 0, 1.0, -1.0).astype(jnp.float32)

    # conv_transpose(stride=1, pad=1): y[co,h,w] =
    #   sum_{dh,dw,ci} x[ci, h+dh, w+dw] * sign(Wtr[ci, co, 1-dh, 1-dw])
    taps = []
    for dh in (-1, 0, 1):
        for dw in (-1, 0, 1):
            taps.append(jnp.transpose(w_bin[:, :, 1 - dh, 1 - dw]))  # (Cout,Cin)
    w_all = jnp.concatenate(taps, axis=1).astype(compute_dtype)      # (Cout,9*Cin)

    scale1d = gamma / jnp.sqrt(var + eps)                            # (Cout,)
    scale = scale1d.reshape(Cout, 1).astype(jnp.float32)
    shift = ((bias - mean) * scale1d + beta).reshape(Cout, 1).astype(jnp.float32)

    # Per-tap validity masks over flattened H*W (shared by every batch element).
    pos = jnp.arange(HW, dtype=jnp.int32)
    hh, ww = pos // W, pos % W
    rows = []
    for dh in (-1, 0, 1):
        for dw in (-1, 0, 1):
            ok = ((hh + dh >= 0) & (hh + dh < H) & (ww + dw >= 0) & (ww + dw < W))
            rows.append(ok)
    masks = jnp.stack(rows, axis=0).astype(compute_dtype)            # (9, HW)

    return {"w_all": w_all, "masks": masks, "scale": scale, "shift": shift}


def segnet_upsample_unit(x_nchw, prepared, *, out_dtype=jnp.float32):
    """Forward pass. x_nchw: (B, Cin, H, W) float32. Returns (B, Cout, H, W)."""
    B, Cin, H, W = x_nchw.shape
    HW = H * W
    w_all = prepared["w_all"]
    masks = prepared["masks"]
    scale = prepared["scale"]
    shift = prepared["shift"]
    Cout = w_all.shape[0]
    assert w_all.shape == (Cout, 9 * Cin) and masks.shape == (9, HW)

    compute_dtype = w_all.dtype
    x_flat = x_nchw.reshape(B, Cin, HW).astype(compute_dtype)   # free reshape

    kernel = functools.partial(_upsample_unit_kernel, H=H, W=W, Cin=Cin, Cout=Cout)

    itemsize = jnp.dtype(compute_dtype).itemsize
    flops = 2 * B * Cout * 9 * Cin * HW
    bytes_accessed = (B * Cin * HW * itemsize                        # x
                      + B * Cout * HW * jnp.dtype(out_dtype).itemsize  # out
                      + Cout * 9 * Cin * itemsize                    # weights
                      + 9 * HW * itemsize                            # masks
                      + 2 * Cout * 4)                                # scale/shift

    out_flat = pl.pallas_call(
        kernel,
        out_shape=jax.ShapeDtypeStruct((B, Cout, HW), out_dtype),
        grid=(B,),
        in_specs=[
            pl.BlockSpec((1, Cin, HW), lambda b: (b, 0, 0)),
            pl.BlockSpec((Cout, 9 * Cin), lambda b: (0, 0)),
            pl.BlockSpec((9, HW), lambda b: (0, 0)),
            pl.BlockSpec((Cout, 1), lambda b: (0, 0)),
            pl.BlockSpec((Cout, 1), lambda b: (0, 0)),
        ],
        out_specs=pl.BlockSpec((1, Cout, HW), lambda b: (b, 0, 0)),
        scratch_shapes=[pltpu.VMEM((9 * Cin, HW), compute_dtype)],
        compiler_params=pltpu.CompilerParams(
            dimension_semantics=("parallel",)),
        cost_estimate=pl.CostEstimate(flops=flops, transcendentals=0,
                                      bytes_accessed=bytes_accessed),
    )(x_flat, w_all, masks, scale, shift)

    return out_flat.reshape(B, Cout, H, W)           # free reshape back to NCHW


def _reference(x_nchw, params, eps=1e-5):
    """Independent pure-JAX reference: scatter form of ConvTranspose2d + BN + ReLU."""
    x = jnp.asarray(x_nchw, jnp.float32)
    w_tr = params["conv_w"]
    w_bin = jnp.where(w_tr >= 0, 1.0, -1.0).astype(jnp.float32)   # (Cin, Cout, 3, 3)
    B, Cin, H, W = x.shape
    Cout = w_tr.shape[1]

    # y_big[i + kh, j + kw] += x[i, j] * W[ci, co, kh, kw]; then crop padding=1.
    y_big = jnp.zeros((B, Cout, H + 2, W + 2), jnp.float32)
    for kh in range(3):
        for kw in range(3):
            contrib = jnp.einsum("bchw,cd->bdhw", x, w_bin[:, :, kh, kw])
            y_big = y_big.at[:, :, kh:kh + H, kw:kw + W].add(contrib)
    y = y_big[:, :, 1:H + 1, 1:W + 1] + params["conv_b"].reshape(1, -1, 1, 1)

    s = params["bn_gamma"] / jnp.sqrt(params["bn_var"] + eps)
    y = (y - params["bn_mean"].reshape(1, -1, 1, 1)) * s.reshape(1, -1, 1, 1) \
        + params["bn_beta"].reshape(1, -1, 1, 1)
    return jnp.maximum(y, 0.0)


def init_params(key, in_channels, out_channels):
    ks = jax.random.split(key, 6)
    return {
        "conv_w": jax.random.normal(ks[0], (in_channels, out_channels, 3, 3), jnp.float32) * 0.5,
        "conv_b": jax.random.normal(ks[1], (out_channels,), jnp.float32) * 0.1,
        "bn_gamma": 1.0 + 0.1 * jax.random.normal(ks[2], (out_channels,), jnp.float32),
        "bn_beta": 0.1 * jax.random.normal(ks[3], (out_channels,), jnp.float32),
        "bn_mean": 0.1 * jax.random.normal(ks[4], (out_channels,), jnp.float32),
        "bn_var": jnp.abs(jax.random.normal(ks[5], (out_channels,), jnp.float32)) + 0.5,
    }


if __name__ == "__main__":
    key = jax.random.PRNGKey(0)
    k_x, k_p = jax.random.split(key)

    B, Cin, Cout, H, W = 2, 4, 8, 16, 16
    x = jax.random.normal(k_x, (B, Cin, H, W), jnp.float32)
    params = init_params(k_p, Cin, Cout)

    # One-time prep (parameter-load time), then a jitted forward that only
    # reshapes x and launches the kernel.
    prepared = prepare_params(params, H, W)           # f32 path keeps 1e-4 tol
    fwd = jax.jit(segnet_upsample_unit)

    out = jax.block_until_ready(fwd(x, prepared))
    ref = jax.block_until_ready(_reference(x, params))
    np.testing.assert_allclose(np.asarray(out), np.asarray(ref), atol=1e-4, rtol=1e-4)

    print("KERNEL_OK")
</pallas_src>

<mosaic_0001>
module attributes {stable_mosaic.version = 11 : i64} {
  func.func @_upsample_unit_kernel(%arg0: i32, %arg1: memref<1x4x256xf32, #tpu.memory_space<vmem>>, %arg2: memref<8x36xf32, #tpu.memory_space<vmem>>, %arg3: memref<9x256xf32, #tpu.memory_space<vmem>>, %arg4: memref<8x1xf32, #tpu.memory_space<vmem>>, %arg5: memref<8x1xf32, #tpu.memory_space<vmem>>, %arg6: memref<1x8x256xf32, #tpu.memory_space<vmem>>, %arg7: memref<36x256xf32, #tpu.memory_space<vmem>>) attributes {dimension_semantics = [#tpu.dimension_semantics<parallel>], iteration_bounds = array<i64: 2>, scalar_prefetch = 0 : i64, scratch_operands = 1 : i64, tpu.core_type = #tpu.core_type<tc>, window_params = [{transform_indices = @transform_0, window_bounds = array<i64: 1, 4, 256>}, {pipeline_mode = #tpu.pipeline_mode<synchronous>, transform_indices = @transform_1, window_bounds = array<i64: 8, 36>}, {pipeline_mode = #tpu.pipeline_mode<synchronous>, transform_indices = @transform_2, window_bounds = array<i64: 9, 256>}, {pipeline_mode = #tpu.pipeline_mode<synchronous>, transform_indices = @transform_3, window_bounds = array<i64: 8, 1>}, {pipeline_mode = #tpu.pipeline_mode<synchronous>, transform_indices = @transform_4, window_bounds = array<i64: 8, 1>}, {transform_indices = @transform_5, window_bounds = array<i64: 1, 8, 256>}]} {
    %c0 = arith.constant 0 : index
    %c0_0 = arith.constant 0 : index
    %c0_1 = arith.constant 0 : index
    %0 = vector.load %arg1[%c0, %c0_0, %c0_1] : memref<1x4x256xf32, #tpu.memory_space<vmem>>, vector<1x4x256xf32>
    %1 = vector.shape_cast %0 : vector<1x4x256xf32> to vector<4x256xf32>
    %c17_i32 = arith.constant 17 : i32
    %2 = tpu.dynamic_rotate %1 by %c17_i32 dim 1 : vector<4x256xf32>, i32 -> vector<4x256xf32>
    %c0_2 = arith.constant 0 : index
    %c0_3 = arith.constant 0 : index
    %3 = vector.load %arg3[%c0_2, %c0_3] : memref<9x256xf32, #tpu.memory_space<vmem>>, vector<1x256xf32>
    %4 = vector.broadcast %3 : vector<1x256xf32> to vector<4x256xf32>
    %5 = arith.mulf %2, %4 : vector<4x256xf32>
    %c0_4 = arith.constant 0 : index
    %c0_5 = arith.constant 0 : index
    %6 = vector.load %arg7[%c0_4, %c0_5] : memref<36x256xf32, #tpu.memory_space<vmem>>, vector<4x256xf32>
    tpu.vector_store %arg7[%c0_4, %c0_5], %5 {strides = array<i32>} : memref<36x256xf32, #tpu.memory_space<vmem>>, vector<4x256xf32>,
    %c16_i32 = arith.constant 16 : i32
    %7 = tpu.dynamic_rotate %1 by %c16_i32 dim 1 : vector<4x256xf32>, i32 -> vector<4x256xf32>
    %c1 = arith.constant 1 : index
    %c0_6 = arith.constant 0 : index
    %8 = vector.load %arg3[%c1, %c0_6] : memref<9x256xf32, #tpu.memory_space<vmem>>, vector<1x256xf32>
    %9 = vector.broadcast %8 : vector<1x256xf32> to vector<4x256xf32>
    %10 = arith.mulf %7, %9 : vector<4x256xf32>
    %c4 = arith.constant 4 : index
    %c0_7 = arith.constant 0 : index
    %11 = vector.load %arg7[%c4, %c0_7] : memref<36x256xf32, #tpu.memory_space<vmem>>, vector<4x256xf32>
    tpu.vector_store %arg7[%c4, %c0_7], %10 {strides = array<i32>} : memref<36x256xf32, #tpu.memory_space<vmem>>, vector<4x256xf32>,
    %c15_i32 = arith.constant 15 : i32
    %12 = tpu.dynamic_rotate %1 by %c15_i32 dim 1 : vector<4x256xf32>, i32 -> vector<4x256xf32>
    %c2 = arith.constant 2 : index
    %c0_8 = arith.constant 0 : index
    %13 = vector.load %arg3[%c2, %c0_8] : memref<9x256xf32, #tpu.memory_space<vmem>>, vector<1x256xf32>
    %14 = vector.broadcast %13 : vector<1x256xf32> to vector<4x256xf32>
    %15 = arith.mulf %12, %14 : vector<4x256xf32>
    %c8 = arith.constant 8 : index
    %c0_9 = arith.constant 0 : index
    %16 = vector.load %arg7[%c8, %c0_9] : memref<36x256xf32, #tpu.memory_space<vmem>>, vector<4x256xf32>
    tpu.vector_store %arg7[%c8, %c0_9], %15 {strides = array<i32>} : memref<36x256xf32, #tpu.memory_space<vmem>>, vector<4x256xf32>,
    %c1_i32 = arith.constant 1 : i32
    %17 = tpu.dynamic_rotate %1 by %c1_i32 dim 1 : vector<4x256xf32>, i32 -> vector<4x256xf32>
    %c3 = arith.constant 3 : index
    %c0_10 = arith.constant 0 : index
    %18 = vector.load %arg3[%c3, %c0_10] : memref<9x256xf32, #tpu.memory_space<vmem>>, vector<1x256xf32>
    %19 = vector.broadcast %18 : vector<1x256xf32> to vector<4x256xf32>
    %20 = arith.mulf %17, %19 : vector<4x256xf32>
    %c12 = arith.constant 12 : index
    %c0_11 = arith.constant 0 : index
    %21 = vector.load %arg7[%c12, %c0_11] : memref<36x256xf32, #tpu.memory_space<vmem>>, vector<4x256xf32>
    tpu.vector_store %arg7[%c12, %c0_11], %20 {strides = array<i32>} : memref<36x256xf32, #tpu.memory_space<vmem>>, vector<4x256xf32>,
    %c16 = arith.constant 16 : index
    %c0_12 = arith.constant 0 : index
    %22 = vector.load %arg7[%c16, %c0_12] : memref<36x256xf32, #tpu.memory_space<vmem>>, vector<4x256xf32>
    tpu.vector_store %arg7[%c16, %c0_12], %1 {strides = array<i32>} : memref<36x256xf32, #tpu.memory_space<vmem>>, vector<4x256xf32>,
    %c255_i32 = arith.constant 255 : i32
    %23 = tpu.dynamic_rotate %1 by %c255_i32 dim 1 : vector<4x256xf32>, i32 -> vector<4x256xf32>
    %c5 = arith.constant 5 : index
    %c0_13 = arith.constant 0 : index
    %24 = vector.load %arg3[%c5, %c0_13] : memref<9x256xf32, #tpu.memory_space<vmem>>, vector<1x256xf32>
    %25 = vector.broadcast %24 : vector<1x256xf32> to vector<4x256xf32>
    %26 = arith.mulf %23, %25 : vector<4x256xf32>
    %c20 = arith.constant 20 : index
    %c0_14 = arith.constant 0 : index
    %27 = vector.load %arg7[%c20, %c0_14] : memref<36x256xf32, #tpu.memory_space<vmem>>, vector<4x256xf32>
    tpu.vector_store %arg7[%c20, %c0_14], %26 {strides = array<i32>} : memref<36x256xf32, #tpu.memory_space<vmem>>, vector<4x256xf32>,
    %c241_i32 = arith.constant 241 : i32
    %28 = tpu.dynamic_rotate %1 by %c241_i32 dim 1 : vector<4x256xf32>, i32 -> vector<4x256xf32>
    %c6 = arith.constant 6 : index
    %c0_15 = arith.constant 0 : index
    %29 = vector.load %arg3[%c6, %c0_15] : memref<9x256xf32, #tpu.memory_space<vmem>>, vector<1x256xf32>
    %30 = vector.broadcast %29 : vector<1x256xf32> to vector<4x256xf32>
    %31 = arith.mulf %28, %30 : vector<4x256xf32>
    %c24 = arith.constant 24 : index
    %c0_16 = arith.constant 0 : index
    %32 = vector.load %arg7[%c24, %c0_16] : memref<36x256xf32, #tpu.memory_space<vmem>>, vector<4x256xf32>
    tpu.vector_store %arg7[%c24, %c0_16], %31 {strides = array<i32>} : memref<36x256xf32, #tpu.memory_space<vmem>>, vector<4x256xf32>,
    %c240_i32 = arith.constant 240 : i32
    %33 = tpu.dynamic_rotate %1 by %c240_i32 dim 1 : vector<4x256xf32>, i32 -> vector<4x256xf32>
    %c7 = arith.constant 7 : index
    %c0_17 = arith.constant 0 : index
    %34 = vector.load %arg3[%c7, %c0_17] : memref<9x256xf32, #tpu.memory_space<vmem>>, vector<1x256xf32>
    %35 = vector.broadcast %34 : vector<1x256xf32> to vector<4x256xf32>
    %36 = arith.mulf %33, %35 : vector<4x256xf32>
    %c28 = arith.constant 28 : index
    %c0_18 = arith.constant 0 : index
    %37 = vector.load %arg7[%c28, %c0_18] : memref<36x256xf32, #tpu.memory_space<vmem>>, vector<4x256xf32>
    tpu.vector_store %arg7[%c28, %c0_18], %36 {strides = array<i32>} : memref<36x256xf32, #tpu.memory_space<vmem>>, vector<4x256xf32>,
    %c239_i32 = arith.constant 239 : i32
    %38 = tpu.dynamic_rotate %1 by %c239_i32 dim 1 : vector<4x256xf32>, i32 -> vector<4x256xf32>
    %c8_19 = arith.constant 8 : index
    %c0_20 = arith.constant 0 : index
    %39 = vector.load %arg3[%c8_19, %c0_20] : memref<9x256xf32, #tpu.memory_space<vmem>>, vector<1x256xf32>
    %40 = vector.broadcast %39 : vector<1x256xf32> to vector<4x256xf32>
    %41 = arith.mulf %38, %40 : vector<4x256xf32>
    %c32 = arith.constant 32 : index
    %c0_21 = arith.constant 0 : index
    %42 = vector.load %arg7[%c32, %c0_21] : memref<36x256xf32, #tpu.memory_space<vmem>>, vector<4x256xf32>
    tpu.vector_store %arg7[%c32, %c0_21], %41 {strides = array<i32>} : memref<36x256xf32, #tpu.memory_space<vmem>>, vector<4x256xf32>,
    %c0_22 = arith.constant 0 : index
    %c0_23 = arith.constant 0 : index
    %43 = vector.load %arg2[%c0_22, %c0_23] : memref<8x36xf32, #tpu.memory_space<vmem>>, vector<8x36xf32>
    %c0_24 = arith.constant 0 : index
    %c0_25 = arith.constant 0 : index
    %44 = vector.load %arg7[%c0_24, %c0_25] : memref<36x256xf32, #tpu.memory_space<vmem>>, vector<36x256xf32>
    %cst = arith.constant dense<0.000000e+00> : vector<8x256xf32>
    %45 = tpu.matmul %43, %44, %cst {dimension_numbers = #tpu.dot_dimension_numbers<[1], [0], [0], [1], [0, 0, 1, 1], [], []>} : vector<8x36xf32>, vector<36x256xf32>, vector<8x256xf32> -> vector<8x256xf32>
    %c0_26 = arith.constant 0 : index
    %c0_27 = arith.constant 0 : index
    %46 = vector.load %arg4[%c0_26, %c0_27] : memref<8x1xf32, #tpu.memory_space<vmem>>, vector<8x1xf32>
    %47 = vector.broadcast %46 : vector<8x1xf32> to vector<8x256xf32>
    %48 = arith.mulf %45, %47 : vector<8x256xf32>
    %c0_28 = arith.constant 0 : index
    %c0_29 = arith.constant 0 : index
    %49 = vector.load %arg5[%c0_28, %c0_29] : memref<8x1xf32, #tpu.memory_space<vmem>>, vector<8x1xf32>
    %50 = vector.broadcast %49 : vector<8x1xf32> to vector<8x256xf32>
    %51 = arith.addf %48, %50 : vector<8x256xf32>
    %cst_30 = arith.constant 0.000000e+00 : f32
    %52 = vector.broadcast %cst_30 : f32 to vector<8x256xf32>
    %53 = arith.maximumf %51, %52 : vector<8x256xf32>
    %c0_31 = arith.constant 0 : index
    %c0_32 = arith.constant 0 : index
    %c0_33 = arith.constant 0 : index
    %54 = vector.load %arg6[%c0_31, %c0_32, %c0_33] : memref<1x8x256xf32, #tpu.memory_space<vmem>>, vector<1x8x256xf32>
    %55 = vector.shape_cast %54 : vector<1x8x256xf32> to vector<8x256xf32>
    %56 = vector.shape_cast %53 : vector<8x256xf32> to vector<1x8x256xf32>
    tpu.vector_store %arg6[%c0_31, %c0_32, %c0_33], %56 {strides = array<i32>} : memref<1x8x256xf32, #tpu.memory_space<vmem>>, vector<1x8x256xf32>,
    return
  }
  func.func @transform_0(%arg0: i32) -> (i32, i32, i32) {
    %c0_i32 = arith.constant 0 : i32
    %c0_i32_0 = arith.constant 0 : i32
    %c0_i32_1 = arith.constant 0 : i32
    return %arg0, %c0_i32, %c0_i32_0 : i32, i32, i32
  }
  func.func @transform_1(%arg0: i32) -> (i32, i32) {
    %c0_i32 = arith.constant 0 : i32
    %c0_i32_0 = arith.constant 0 : i32
    %c0_i32_1 = arith.constant 0 : i32
    return %c0_i32, %c0_i32_0 : i32, i32
  }
  func.func @transform_2(%arg0: i32) -> (i32, i32) {
    %c0_i32 = arith.constant 0 : i32
    %c0_i32_0 = arith.constant 0 : i32
    %c0_i32_1 = arith.constant 0 : i32
    return %c0_i32, %c0_i32_0 : i32, i32
  }
  func.func @transform_3(%arg0: i32) -> (i32, i32) {
    %c0_i32 = arith.constant 0 : i32
    %c0_i32_0 = arith.constant 0 : i32
    %c0_i32_1 = arith.constant 0 : i32
    return %c0_i32, %c0_i32_0 : i32, i32
  }
  func.func @transform_4(%arg0: i32) -> (i32, i32) {
    %c0_i32 = arith.constant 0 : i32
    %c0_i32_0 = arith.constant 0 : i32
    %c0_i32_1 = arith.constant 0 : i32
    return %c0_i32, %c0_i32_0 : i32, i32
  }
  func.func @transform_5(%arg0: i32) -> (i32, i32, i32) {
    %c0_i32 = arith.constant 0 : i32
    %c0_i32_0 = arith.constant 0 : i32
    %c0_i32_1 = arith.constant 0 : i32
    return %arg0, %c0_i32, %c0_i32_0 : i32, i32, i32
  }
}

</mosaic_0001>

<bundles_post_ra>
// kernel: segnet_upsample_unit.1
= control target key start
LH: loop header
LB: loop body
LE: loop exit
PB: predicated region body
PF: predicated region fallthrough
CT: control target
= control target key end

     0   :  { %s708_s18 = smov 0   ;;  %s814_s0 = inlined_call_operand.vmem [shape: f32[2,4,256], index: 0, kind: input, shape index: {}]   ;;  %s815_s1 = inlined_call_operand.vmem [shape: f32[8,36], index: 1, kind: input, shape index: {}]   ;;  %s816_s2 = inlined_call_operand.vmem [shape: f32[9,256], index: 2, kind: input, shape index: {}]   ;;  %s817_s3 = inlined_call_operand.vmem [shape: f32[8,1], index: 3, kind: input, shape index: {}]   ;;  %s818_s4 = inlined_call_operand.vmem [shape: f32[8,1], index: 4, kind: input, shape index: {}]   ;;  %s819_s5 = inlined_call_operand.vmem [shape: f32[2,8,256], index: 5, kind: output, shape index: {}]  }
   0x1 LB: > { %s616_s19 = sadd.s32 4294967295, %s666_s18   ;;  %p620_p0 = scmp.ge.s32.totalorder %s666_s18, 1  ;;  %s666_s18 = sphi %s708_s18, %s15_s18  }
   0x2   : > { %p187_p1 = scmp.lt.s32.totalorder %s666_s18, 3 }
   0x4   : > { %p188_p2 = pnand %p620_p0, %p187_p1 }
   0x5   : > { %p215_p3 = scmp.lt.s32.totalorder (!%p188_p2), %s616_s19, 1  ;;  %s668_s24 = smov (!%p188_p2), 111  }
   0x6   : > { %191 = sbr.rel (%p188_p2) target bundleno = 373 (0x175), region = 40  ;;  %s669_s25 = smov (!%p188_p2), 112  }
   0x7   : > { %s670_s26 = smov (!%p188_p2), 127   ;;  %s671_s27 = smov (!%p188_p2), 113  }
   0x8   : > { %s672_s28 = smov (!%p188_p2), 1   ;;  %s673_s29 = smov (!%p188_p2), 16  }
   0x9   : > { %s674_s30 = smov (!%p188_p2), 15   ;;  %s676_s6 = smov (!%p188_p2), 17  }
   0xb   : > { %s821_s19 = smov (!%p215_p3, %s616_s19), 1  ;;  %v675_v2 = vmov 0.0   ;;  %v677_v3 = vmov 0   ;;  %v541_v4 = vld [vmem:[%s817_s3] sm:$0xff]  ;;  %v233_v6 = vlaneseq  ;;  %vm463_vm4 = vcmask 1043456  }
   0xc   : > { %s637_s20 = sshll.u32 %s821_s19, 3  ;;  %534 = vmatprep.mubr.f32.mxu0 %v675_v2  ;;  %657 = vset.pattern.permute.xlu0 %v677_v3  ;;  %v549_v5 = vld [vmem:[%s818_s4] sm:$0xff]  ;;  %v631_v11 = vld [vmem:[%s816_s2 + $0x10] ss:$8 sm:$0x3]  ;;  %vm459_vm9 = vcmask 293888  }
   0xd   : > { %s219_s23 = scalar_lea.vmem %s814_s0, %s637_s20  ;;  %658 = vset.pattern.permute.xlu1 %v677_v3  ;;  %v241_v7 = vshrl.u32 %v233_v6, 7  ;;  %v728_v8 = vand.u32 127, %v233_v6  ;;  %v628_v16 = vld [vmem:[%s816_s2 + $0x5] ss:$8 sm:$0x3] }
   0xe   : > { %v225_v0 = vld [vmem:[%s219_s23] sm:$0xff] }
   0xf   : > { %424 = vrot.lane.b32.xlu1 %v225_v0, %s668_s24  ;;  %338 = vst [vmem:[#allocation2 + $0x48] sm:$0xf] %v225_v0  ;;  %394 = vrot.lane.b32.xlu0 %v225_v0, %s669_s25  ;;  %v227_v1 = vcombine.high %v225_v0, %v225_v0  ;;  %v730_v9 = vsub.s32 0, %v241_v7  ;;  %v732_v10 = vsub.s32 1, %v241_v7  ;;  %vm428_vm0 = vcmp.lt.s32.totalorder %v728_v8, 111 }
  0x10   : > { %v630_v17 = vld [vmem:[%s816_s2 + $0x7] ss:$8 sm:$0x3]  ;;  %vm344_vm1 = vcmp.lt.s32.totalorder %v728_v8, 127  ;;  %vm398_vm2 = vcmp.lt.s32.totalorder %v728_v8, 112  ;;  %vm374_vm3 = vcmp.lt.s32.totalorder %v728_v8, 113 }
  0x11   : > { %339 = vst [vmem:[#allocation2 + $0x28] sm:$0xf] %v227_v1  ;;  %v437_v14 = vrot.slane %v631_v11, %v730_v9  ;;  %v441_v15 = vrot.slane %v631_v11, %v732_v10  ;;  %v353_v22 = vrot.slane %v628_v16, %v730_v9  ;;  %v357_v23 = vrot.slane %v628_v16, %v732_v10  ;;  %v629_v24 = vld [vmem:[%s816_s2 + $0x6] ss:$8 sm:$0x3] }
  0x12   : > { %v407_v27 = vrot.slane %v630_v17, %v730_v9  ;;  %v411_v28 = vrot.slane %v630_v17, %v732_v10  ;;  %v383_v31 = vrot.slane %v629_v24, %v730_v9  ;;  %v387_v32 = vrot.slane %v629_v24, %v732_v10  ;;  %v627_v41 = vld [vmem:[%s816_s2 + $0x3] ss:$8 sm:$0x3]  ;;  %v625_v54 = vld [vmem:[%s816_s2 + $0x1] ss:$8 sm:$0x3] }
  0x13   : > { %340 = vrot.lane.b32.xlu0 %v225_v0, %s670_s26  ;;  %426 = vrot.lane.b32.xlu1 %v227_v1, %s668_s24  ;;  %vm312_vm5 = vcmp.lt.s32.totalorder %v728_v8, 1  ;;  %v321_v52 = vrot.slane %v627_v41, %v730_v9  ;;  %v325_v53 = vrot.slane %v627_v41, %v732_v10  ;;  %vm258_vm6 = vcmp.lt.s32.totalorder %v728_v8, 16  ;;  %v238_v17 = vld [vmem:[%s816_s2] ss:$8 sm:$0x3] }
  0x14   : > { %v267_v63 = vrot.slane %v625_v54, %v730_v9  ;;  %vm288_vm7 = vcmp.lt.s32.totalorder %v728_v8, 15  ;;  %vm235_vm8 = vcmp.lt.s32.totalorder %v728_v8, 17 }
  0x17   : > { %342 = vrot.lane.b32.xlu1 %v227_v1, %s670_s26  ;;  %396 = vrot.lane.b32.xlu0 %v227_v1, %s669_s25 }
  0x1b   : > { %372 = vrot.lane.b32.xlu1 %v227_v1, %s671_s27  ;;  %370 = vrot.lane.b32.xlu0 %v225_v0, %s671_s27 }
  0x1f   : > { %310 = vrot.lane.b32.xlu1 %v227_v1, %s672_s28  ;;  %308 = vrot.lane.b32.xlu0 %v225_v0, %s672_s28 }
  0x23   : > { %256 = vrot.lane.b32.xlu1 %v227_v1, %s673_s29  ;;  %254 = vrot.lane.b32.xlu0 %v225_v0, %s673_s29 }
  0x27   : > { %286 = vrot.lane.b32.xlu1 %v227_v1, %s674_s30  ;;  %284 = vrot.lane.b32.xlu0 %v225_v0, %s674_s30 }
  0x2b   : > { %231 = vrot.lane.b32.xlu1 %v227_v1, %s676_s6  ;;  %229 = vrot.lane.b32.xlu0 %v225_v0, %s676_s6  ;;  %v271_v0 = vrot.slane %v625_v54, %v732_v10  ;;  %v626_v1 = vld [vmem:[%s816_s2 + $0x2] ss:$8 sm:$0x3]  ;;  %s638_s6 = sshll.u32 %s821_s19, 4 }
  0x2c   : > { %s224_s9 = scalar_lea.vmem %s819_s5, %s638_s6 }
  0x2f   : > { %544 = vperm.xlu0 %657, %v541_v4   ;;  %552 = vperm.xlu1 %658, %v549_v5  }
  0x81   : > { %v425_v12 = vpop.permute.xlu1 %424  ;;  %v395_v13 = vpop.permute.xlu0 %394 }
  0x85   : > { %v341_v18 = vpop.permute.xlu0 %340  ;;  %v427_v19 = vpop.permute.xlu1 %426 }
  0x86   : > { %v429_v20 = vsel %vm428_vm0, %v425_v12, %v427_v19  ;;  %v430_v21 = vsel %vm428_vm0, %v427_v19, %v425_v12 }
  0x87   : > { %v444_v25 = vmul.f32 %v437_v14, %v429_v20  ;;  %v445_v26 = vmul.f32 %v441_v15, %v430_v21  ;;  %v301_v14 = vrot.slane %v626_v1, %v732_v10 }
  0x89   : > { %446 = vst [vmem:[#allocation2 + $0x40] sm:$0xf] %v444_v25  ;;  %447 = vst [vmem:[#allocation2 + $0x38] sm:$0xf] %v445_v26  ;;  %v343_v29 = vpop.permute.xlu1 %342  ;;  %v397_v30 = vpop.permute.xlu0 %396 }
  0x8a   : > { %v345_v33 = vsel %vm344_vm1, %v341_v18, %v343_v29  ;;  %v346_v34 = vsel %vm344_vm1, %v343_v29, %v341_v18  ;;  %v399_v35 = vsel %vm398_vm2, %v395_v13, %v397_v30  ;;  %v400_v36 = vsel %vm398_vm2, %v397_v30, %v395_v13 }
  0x8b   : > { %v360_v37 = vmul.f32 %v353_v22, %v345_v33  ;;  %v361_v38 = vmul.f32 %v357_v23, %v346_v34  ;;  %v414_v39 = vmul.f32 %v407_v27, %v399_v35  ;;  %v415_v40 = vmul.f32 %v411_v28, %v400_v36 }
  0x8c   : > { %v297_v13 = vrot.slane %v626_v1, %v730_v9  ;;  %v243_v28 = vrot.slane %v238_v17, %v730_v9  ;;  %v247_v29 = vrot.slane %v238_v17, %v732_v10  ;;  %v448_v10 = vld [vmem:[%s815_s1] sm:$0xff] }
  0x8d   : > { %v364_v42 = vrot.slane %v360_v37, 4  ;;  %v365_v43 = vrot.slane %v361_v38, 4  ;;  %v418_v44 = vrot.slane %v414_v39, 4  ;;  %v419_v45 = vrot.slane %v415_v40, 4  ;;  %v373_v46 = vpop.permute.xlu1 %372  ;;  %v371_v47 = vpop.permute.xlu0 %370 }
  0x8e   : > { %v375_v48 = vsel %vm374_vm3, %v371_v47, %v373_v46  ;;  %v376_v49 = vsel %vm374_vm3, %v373_v46, %v371_v47 }
  0x8f   : > { %368 = vst [vmem:[#allocation2 + $0x48] sm:$0xf0] %v364_v42  ;;  %369 = vst [vmem:[#allocation2 + $0x28] sm:$0xf0] %v365_v43  ;;  %v390_v50 = vmul.f32 %v383_v31, %v375_v48  ;;  %v391_v51 = vmul.f32 %v387_v32, %v376_v49 }
  0x90   : > { %422 = vst [vmem:[#allocation2 + $0x8] sm:$0xf0] %v418_v44  ;;  %423 = vst [vmem:[#allocation2 + $0x20] sm:$0xf0] %v419_v45  ;;  %v458_v55 = vld [vmem:[#allocation2 + $0x38] sm:$0xf] }
  0x91   : > { %v457_v56 = vld [vmem:[#allocation2 + $0x40] sm:$0xf]  ;;  %392 = vst [vmem:[#allocation2 + $0x8] sm:$0xf] %v390_v50  ;;  %393 = vst [vmem:[#allocation2 + $0x20] sm:$0xf] %v391_v51  ;;  %632 = vmatprep.subr.msk.mxu0 %vm463_vm4, %v458_v55  ;;  %v311_v57 = vpop.permute.xlu1 %310  ;;  %v309_v58 = vpop.permute.xlu0 %308 }
  0x92   : > { %v313_v59 = vsel %vm312_vm5, %v309_v58, %v311_v57  ;;  %v314_v60 = vsel %vm312_vm5, %v311_v57, %v309_v58  ;;  %633 = vmatpush1.msk.msra.mxu0 %vm463_vm4, %v457_v56 }
  0x93   : > { %v328_v61 = vmul.f32 %v321_v52, %v314_v60  ;;  %v329_v62 = vmul.f32 %v325_v53, %v313_v59 }
  0x95   : > { %v332_v2 = vrot.slane %v328_v61, 4  ;;  %v333_v3 = vrot.slane %v329_v62, 4  ;;  %v257_v4 = vpop.permute.xlu1 %256  ;;  %v255_v5 = vpop.permute.xlu0 %254 }
  0x96   : > { %v259_v6 = vsel %vm258_vm6, %v255_v5, %v257_v4  ;;  %v260_v7 = vsel %vm258_vm6, %v257_v4, %v255_v5  ;;  %v454_v24 = vld [vmem:[#allocation2 + $0x28] sm:$0xff] }
  0x97   : > { %336 = vst [vmem:[#allocation2 + $0x18] sm:$0xf0] %v332_v2  ;;  %337 = vst [vmem:[#allocation2 + $0x10] sm:$0xf0] %v333_v3  ;;  %v274_v11 = vmul.f32 %v267_v63, %v260_v7  ;;  %v275_v12 = vmul.f32 %v271_v0, %v259_v6  ;;  %v453_v27 = vld [vmem:[#allocation2 + $0x48] sm:$0xff] }
  0x98   : > { %v456_v15 = vld [vmem:[#allocation2 + $0x20] sm:$0xff]  ;;  %v455_v16 = vld [vmem:[#allocation2 + $0x8] sm:$0xff] }
  0x99   : > { %v278_v18 = vrot.slane %v274_v11, 4  ;;  %v279_v19 = vrot.slane %v275_v12, 4  ;;  %v287_v20 = vpop.permute.xlu1 %286  ;;  %494 = vmatprep.subr.mxu0 %v456_v15  ;;  %v285_v21 = vpop.permute.xlu0 %284 }
  0x9a   : > { %v289_v22 = vsel %vm288_vm7, %v285_v21, %v287_v20  ;;  %v290_v23 = vsel %vm288_vm7, %v287_v20, %v285_v21  ;;  %495 = vmatpush1.msra.mxu0 %v455_v16 }
  0x9b   : > { %282 = vst [vmem:[#allocation2 + $0x30] sm:$0xf0] %v278_v18  ;;  %283 = vst [vmem:[#allocation2] sm:$0xf0] %v279_v19  ;;  %v304_v25 = vmul.f32 %v297_v13, %v290_v23  ;;  %v305_v26 = vmul.f32 %v301_v14, %v289_v22  ;;  %496 = vmatprep.subr.mxu0 %v454_v24 }
  0x9c   : > { %497 = vmatpush1.msra.mxu0 %v453_v27 }
  0x9d   : > { %306 = vst [vmem:[#allocation2 + $0x18] sm:$0xf] %v304_v25  ;;  %307 = vst [vmem:[#allocation2 + $0x10] sm:$0xf] %v305_v26  ;;  %v232_v30 = vpop.permute.xlu1 %231  ;;  %v230_v31 = vpop.permute.xlu0 %229 }
  0x9e   : > { %v236_v32 = vsel %vm235_vm8, %v230_v31, %v232_v30  ;;  %v237_v33 = vsel %vm235_vm8, %v232_v30, %v230_v31 }
  0x9f   : > { %v250_v34 = vmul.f32 %v243_v28, %v237_v33  ;;  %v251_v35 = vmul.f32 %v247_v29, %v236_v32 }
  0xa1   : > { %252 = vst [vmem:[#allocation2 + $0x30] sm:$0xf] %v250_v34  ;;  %253 = vst [vmem:[#allocation2] sm:$0xf] %v251_v35 }
  0xa4   : > { %v452_v8 = vld [vmem:[#allocation2 + $0x10] sm:$0xff]  ;;  %v451_v36 = vld [vmem:[#allocation2 + $0x18] sm:$0xff] }
  0xa5   : > { %498 = vmatprep.subr.mxu0 %v452_v8 }
  0xa6   : > { %499 = vmatpush1.msra.mxu0 %v451_v36 }
  0xa8   : > { %v450_v37 = vld [vmem:[#allocation2] sm:$0xff]  ;;  %v449_v9 = vld [vmem:[#allocation2 + $0x30] sm:$0xff] }
  0xa9   : > { %500 = vmatprep.subr.mxu0 %v450_v37 }
  0xaa   : > { %501 = vmatpush1.msra.mxu0 %v449_v9  ;;  %v545_v38 = vpop.permute.xlu0 %544  ;;  %v553_v40 = vpop.permute.xlu1 %552 }
  0xab   : > { %634 = vmatmul.mubr.msk.f32.vlgmr.msra.gmra.mxu0 %vm459_vm9, %v448_v10 }
 0x16b   : > { %v536_v39 = vpop.f32.mrf.mxu0 }
 0x16c   : > { %v547_v41 = vmul.f32 %v545_v38, %v536_v39 }
 0x16d   : > { %v538_v42 = vpop.f32.mrf.mxu0 }
 0x16e   : > { %v555_v43 = vadd.f32 %v553_v40, %v547_v41  ;;  %v548_v44 = vmul.f32 %v545_v38, %v538_v42 }
 0x170   : > { %v557_v45 = vmax.f32 %v555_v43, 0.0  ;;  %v556_v46 = vadd.f32 %v553_v40, %v548_v44 }
 0x172   : > { %559 = vst [vmem:[%s224_s9] sm:$0xff] %v557_v45  ;;  %v558_v47 = vmax.f32 %v556_v46, 0.0 }
 0x174   : > { %560 = vst [vmem:[%s224_s9 + $0x8] sm:$0xff] %v558_v47 }
 0x175 PF: > { %s15_s18 = sadd.s32 1, %s666_s18  }
 0x176   : > { %p12_p4 = scmp.ge.s32.totalorder %s15_s18, 4  }
 0x178   :  { %14 = sbr.rel (!%p12_p4) target bundleno = 1 (0x1), region = 77 }

</bundles_post_ra>
